<compile_context>
chip_gen: v7x
topology: tpu7x:2x2x1
jax: 0.10.0
libtpu: 0.0.40
codegen_flags: <defaults>
</compile_context>

<pallas_src>
import jax
import jax.numpy as jnp
from jax import lax
from jax.experimental import pallas as pl
from jax.experimental.pallas import tpu as pltpu


def _round_up(x: int, m: int) -> int:
    return ((x + m - 1) // m) * m


def _resident_spec(block_shape, index_map):
    """BlockSpec for an operand whose index_map is constant across the grid.

    It is fetched once and never revisited, so a single VMEM buffer suffices
    (halves its footprint). Falls back to the default double-buffered spec on
    jax versions without `pipeline_mode`.
    """
    try:
        return pl.BlockSpec(block_shape, index_map, pipeline_mode=pl.Buffered(1))
    except TypeError:  # pragma: no cover - older jax without pipeline_mode
        return pl.BlockSpec(block_shape, index_map)


# ----------------------------------------------------------------------------
# Pallas kernel: project one (channels, tokens) tile to (tokens, embed).
#   x_ref: (C, tn)   w_ref: (C, Ep)   b_ref: (1, Ep) f32   o_ref: (tn, Ep)
# ----------------------------------------------------------------------------
def hybrid_embed_proj_kernel(x_ref, w_ref, b_ref, o_ref):
    # Contract the channel (sublane) axis of the CNN-layout tile against the
    # weight's input axis: (C, tn) x (C, Ep) -> (tn, Ep). The small in-tile
    # transpose this implies is handled by the MXU/XLU and is far cheaper than
    # an HBM-level transpose in the wrapper.
    acc = lax.dot_general(
        x_ref[...], w_ref[...],
        dimension_numbers=(((0,), (0,)), ((), ())),
        preferred_element_type=jnp.float32,
    )
    o_ref[...] = (acc + b_ref[...]).astype(o_ref.dtype)   # bias add in f32


# ----------------------------------------------------------------------------
# Wrapper: block the CNN feature map directly (no transpose, no token pad),
# run the projection on a (batch, token-tile) grid, strip E padding if any.
# ----------------------------------------------------------------------------
def hybrid_embed_pallas(feat, w, b, *, tn_max=512, compute_dtype=jnp.bfloat16):
    """HybridEmbed forward (minus the CNN backbone).

    feat: (B, C_feat, Hf, Wf)  CNN feature map (output of the backbone).
    w:    (C_feat, E)          projection weight, stored (in, out).
    b:    (E,)                 projection bias.
    Returns (B, Hf*Wf, E) in feat.dtype.
    """
    B, C, Hf, Wf = feat.shape
    E = w.shape[1]
    N = Hf * Wf
    out_dtype = feat.dtype

    # Contiguous reshape only (free): kernel consumes CNN layout directly.
    x3d = feat.reshape(B, C, N)

    # bf16 operands halve streamed HBM bytes; accumulation stays f32 in-kernel.
    if compute_dtype is not None and x3d.dtype != compute_dtype:
        x3d = x3d.astype(compute_dtype)
    w_c = w.astype(compute_dtype) if compute_dtype is not None else w

    # Only the (tiny, one-time) weight/bias are zero-padded so the output's
    # last dim is lane-dense (multiple of 128 -> unmasked vst).
    Ep = _round_up(E, 128)
    w_p = jnp.pad(w_c, ((0, 0), (0, Ep - E))) if Ep != E else w_c
    b_p = jnp.pad(b.astype(jnp.float32).reshape(1, E), ((0, 0), (0, Ep - E)))

    # Token tile: full extent when small (always layout-legal), otherwise a
    # multiple of 128; the ragged last block is masked by Pallas.
    tn = N if N <= tn_max else tn_max
    grid = (B, pl.cdiv(N, tn))

    # VMEM budget (double-buffered x/out tiles, single-buffered weight) with
    # 2x headroom, clamped to the smallest per-generation scoped budget.
    isz_in = jnp.dtype(x3d.dtype).itemsize
    isz_out = jnp.dtype(out_dtype).itemsize
    vmem_est = (2 * C * tn * isz_in            # activation tile (double-buffered)
                + C * Ep * isz_in              # resident weight (single buffer)
                + 2 * Ep * 4                   # resident bias (f32)
                + 2 * tn * Ep * isz_out)       # output tile (double-buffered)
    vmem_limit = int(min(32 * 1024 * 1024, max(16 * 1024 * 1024, 2 * vmem_est)))

    cost = pl.CostEstimate(
        flops=int(2 * B * N * C * Ep),
        transcendentals=0,
        bytes_accessed=int(x3d.size * isz_in + w_p.size * isz_in
                           + b_p.size * 4 + B * N * Ep * isz_out),
    )

    out = pl.pallas_call(
        hybrid_embed_proj_kernel,
        out_shape=jax.ShapeDtypeStruct((B, N, Ep), out_dtype),
        grid_spec=pltpu.PrefetchScalarGridSpec(
            num_scalar_prefetch=0,
            grid=grid,
            in_specs=[
                # Streamed activation tile, straight from the CNN layout
                # (channels on sublanes, tokens on lanes).
                pl.BlockSpec((None, C, tn), lambda bi, j: (bi, 0, j)),
                # Resident weight + bias: constant index map, single buffer.
                _resident_spec((C, Ep), lambda bi, j: (0, 0)),
                _resident_spec((1, Ep), lambda bi, j: (0, 0)),
            ],
            out_specs=pl.BlockSpec((None, tn, Ep), lambda bi, j: (bi, j, 0)),
        ),
        compiler_params=pltpu.CompilerParams(
            dimension_semantics=("parallel", "parallel"),  # sharded across TCs
            vmem_limit_bytes=vmem_limit,
        ),
        cost_estimate=cost,
    )(x3d, w_p, b_p)

    if Ep != E:
        out = out[:, :, :E]
    return out


# ----------------------------------------------------------------------------
# Plain-JAX stand-in for the external CNN backbone (deterministic strided conv)
# and a pure-JAX reference for the projection path.
# ----------------------------------------------------------------------------
def standin_backbone(x, conv_w):
    """x: (B, in_chans, H, W) -> feature map (B, C_feat, H/4, W/4)."""
    # TODO(synk): the real HybridEmbed backbone is an arbitrary external CNN;
    #             this strided conv only produces a feature map for the demo.
    return lax.conv_general_dilated(
        x, conv_w,
        window_strides=(4, 4), padding="VALID",
        dimension_numbers=("NCHW", "OIHW", "NCHW"),
    )


def reference_hybrid_embed(feat, w, b):
    B, C, Hf, Wf = feat.shape
    tok = feat.reshape(B, C, Hf * Wf).transpose(0, 2, 1).astype(jnp.float32)
    out = jnp.einsum("bnc,ce->bne", tok, w.astype(jnp.float32)) + b.astype(jnp.float32)
    return out.astype(feat.dtype)


if __name__ == "__main__":
    # Small shapes consistent with the module:
    #   image (2, 3, 32, 32) -> backbone feature map (2, 32, 8, 8)
    #   -> tokens (2, 64, 32) -> projection to embed_dim=64.
    B, in_chans, H, W = 2, 3, 32, 32
    C_feat, embed_dim = 32, 64

    key = jax.random.PRNGKey(0)
    kx, kc, kw, kb = jax.random.split(key, 4)

    x = jax.random.normal(kx, (B, in_chans, H, W), dtype=jnp.float32)
    conv_w = jax.random.normal(kc, (C_feat, in_chans, 4, 4), dtype=jnp.float32) * 0.05
    proj_w = jax.random.normal(kw, (C_feat, embed_dim), dtype=jnp.float32) * 0.02
    proj_b = jax.random.normal(kb, (embed_dim,), dtype=jnp.float32) * 0.01

    feat = standin_backbone(x, conv_w)          # (2, 32, 8, 8)

    y = hybrid_embed_pallas(feat, proj_w, proj_b)
    y = jax.block_until_ready(y)

    y_ref = reference_hybrid_embed(feat, proj_w, proj_b)
    assert y.shape == (B, (H // 4) * (W // 4), embed_dim)
    # bf16 operand rounding vs. the f32 reference -> loosened tolerance.
    assert jnp.allclose(y, y_ref, atol=2e-2, rtol=2e-2), "mismatch vs reference"

    print("KERNEL_OK")
</pallas_src>

<mosaic_0001>
module attributes {stable_mosaic.version = 11 : i64} {
  func.func @hybrid_embed_proj_kernel(%arg0: i32, %arg1: i32, %arg2: memref<1x32x64xbf16, #tpu.memory_space<vmem>>, %arg3: memref<32x128xbf16, #tpu.memory_space<vmem>>, %arg4: memref<1x128xf32, #tpu.memory_space<vmem>>, %arg5: memref<1x64x128xf32, #tpu.memory_space<vmem>>) attributes {dimension_semantics = [#tpu.dimension_semantics<parallel>, #tpu.dimension_semantics<parallel>], iteration_bounds = array<i64: 2, 1>, scalar_prefetch = 0 : i64, scratch_operands = 0 : i64, tpu.core_type = #tpu.core_type<tc>, window_params = [{transform_indices = @transform_0, window_bounds = array<i64: 1, 32, 64>}, {pipeline_mode = #tpu.pipeline_mode<synchronous>, transform_indices = @transform_1, window_bounds = array<i64: 32, 128>}, {pipeline_mode = #tpu.pipeline_mode<synchronous>, transform_indices = @transform_2, window_bounds = array<i64: 1, 128>}, {transform_indices = @transform_3, window_bounds = array<i64: 1, 64, 128>}]} {
    %c0 = arith.constant 0 : index
    %c0_0 = arith.constant 0 : index
    %c0_1 = arith.constant 0 : index
    %0 = vector.load %arg2[%c0, %c0_0, %c0_1] : memref<1x32x64xbf16, #tpu.memory_space<vmem>>, vector<1x32x64xbf16>
    %1 = vector.shape_cast %0 : vector<1x32x64xbf16> to vector<32x64xbf16>
    %c0_2 = arith.constant 0 : index
    %c0_3 = arith.constant 0 : index
    %2 = vector.load %arg3[%c0_2, %c0_3] : memref<32x128xbf16, #tpu.memory_space<vmem>>, vector<32x128xbf16>
    %cst = arith.constant dense<0.000000e+00> : vector<64x128xf32>
    %3 = tpu.matmul %1, %2, %cst {dimension_numbers = #tpu.dot_dimension_numbers<[0], [0], [1], [1], [0, 1, 1, 1], [], []>} : vector<32x64xbf16>, vector<32x128xbf16>, vector<64x128xf32> -> vector<64x128xf32>
    %c0_4 = arith.constant 0 : index
    %c0_5 = arith.constant 0 : index
    %4 = vector.load %arg4[%c0_4, %c0_5] : memref<1x128xf32, #tpu.memory_space<vmem>>, vector<1x128xf32>
    %5 = vector.broadcast %4 : vector<1x128xf32> to vector<64x128xf32>
    %6 = arith.addf %3, %5 : vector<64x128xf32>
    %c0_6 = arith.constant 0 : index
    %c0_7 = arith.constant 0 : index
    %c0_8 = arith.constant 0 : index
    %7 = vector.load %arg5[%c0_6, %c0_7, %c0_8] : memref<1x64x128xf32, #tpu.memory_space<vmem>>, vector<1x64x128xf32>
    %8 = vector.shape_cast %7 : vector<1x64x128xf32> to vector<64x128xf32>
    %9 = vector.shape_cast %6 : vector<64x128xf32> to vector<1x64x128xf32>
    tpu.vector_store %arg5[%c0_6, %c0_7, %c0_8], %9 {strides = array<i32>} : memref<1x64x128xf32, #tpu.memory_space<vmem>>, vector<1x64x128xf32>,
    return
  }
  func.func @transform_0(%arg0: i32, %arg1: i32) -> (i32, i32, i32) {
    %c0_i32 = arith.constant 0 : i32
    %c0_i32_0 = arith.constant 0 : i32
    return %arg0, %c0_i32, %arg1 : i32, i32, i32
  }
  func.func @transform_1(%arg0: i32, %arg1: i32) -> (i32, i32) {
    %c0_i32 = arith.constant 0 : i32
    %c0_i32_0 = arith.constant 0 : i32
    %c0_i32_1 = arith.constant 0 : i32
    return %c0_i32, %c0_i32_0 : i32, i32
  }
  func.func @transform_2(%arg0: i32, %arg1: i32) -> (i32, i32) {
    %c0_i32 = arith.constant 0 : i32
    %c0_i32_0 = arith.constant 0 : i32
    %c0_i32_1 = arith.constant 0 : i32
    return %c0_i32, %c0_i32_0 : i32, i32
  }
  func.func @transform_3(%arg0: i32, %arg1: i32) -> (i32, i32, i32) {
    %c0_i32 = arith.constant 0 : i32
    %c0_i32_0 = arith.constant 0 : i32
    return %arg0, %arg1, %c0_i32 : i32, i32, i32
  }
}

</mosaic_0001>

<bundles_post_ra>
// kernel: tpu_custom_call.1
= control target key start
LH: loop header
LB: loop body
LE: loop exit
PB: predicated region body
PF: predicated region fallthrough
CT: control target
= control target key end

     0   :  { %8 = vsyncpa [#allocation3], 0  ;;  %s1010_s0 = inlined_call_operand.hbm [shape: bf16[2,32,64], index: 0, kind: input, shape index: {}]   ;;  %s1011_s1 = inlined_call_operand.hbm [shape: bf16[32,128], index: 1, kind: input, shape index: {}]   ;;  %s1012_s2 = inlined_call_operand.vmem [shape: f32[1,128], index: 2, kind: input, shape index: {}]   ;;  %s1013_s3 = inlined_call_operand.hbm [shape: f32[2,64,128], index: 3, kind: output, shape index: {}]  }
   0x1   :  { %10 = vsyncpa [#allocation3 + $0x1], 0 }
   0x2   :  { %11 = vsyncpa [#allocation6], 0 }
   0x3   :  { %12 = vsyncpa [#allocation4], 0 }
   0x4   :  { %14 = vsyncpa [#allocation4 + $0x1], 0  ;;  %s781_s12 = smov 0   ;;  %s783_s13 = smov 0  }
   0x5   :  { %s785_s14 = smov 0   ;;  %s787_s15 = smov 0  }
   0x6   :  { %s789_s16 = smov 0   ;;  %s791_s17 = smov 0  }
   0x7 LB: > { %s476_s18 = sadd.s32 4294967295, %s752_s17   ;;  %s477_s19 = sadd.s32 4294967294, %s752_s17   ;;  %s752_s17 = sphi %s791_s17, %s20_s17   ;;  %s748_s16 = sphi %s789_s16, %s1037_s16   ;;  %s744_s15 = sphi %s787_s15, %s1036_s15   ;;  %s740_s14 = sphi %s785_s14, %s1035_s14   ;;  %s736_s13 = sphi %s783_s13, %s1034_s13   ;;  %s732_s12 = sphi %s781_s12, %s1033_s12  }
   0x8   : > { %p54_p0 = scmp.ne.s32.totalorder %s736_s13, %s732_s12  ;;  %p815_p1 = scmp.eq.s32.totalorder %s476_s18, 0 }
   0x9   : > { %p819_p2 = scmp.eq.s32.totalorder %s476_s18, 1  ;;  %p128_p3 = scmp.eq.s32.totalorder %s477_s19, 1 }
   0xa   : > { %s1018_s20 = scalar_select %p815_p1, 1, 0 }
   0xb   : > { %s1019_s21 = scalar_select %p819_p2, 1, 0 }
   0xc   : > { %p825_p4 = por %p815_p1, %p54_p0  ;;  %p478_p5 = scmp.ge.s32.totalorder %s752_s17, 1 }
   0xd   : > { %p830_p6 = por %p128_p3, %p54_p0  ;;  %p135_p7 = scmp.lt.s32.totalorder %s752_s17, 3 }
   0xe   : > { %s1020_s22 = scalar_select %p825_p4, 1, 0 }
   0xf   : > { %s1021_s23 = scalar_select %p830_p6, 1, 0 }
  0x10   : > { %p835_p8 = pnand %p478_p5, %p135_p7  ;;  %s754_s25 = smov [#allocation5]  }
  0x11   : > { %s147_s26 = sshll.u32 %s754_s25, 4  ;;  %s32_s28 = sadd.s32 1, %s748_s16  ;;  %s148_s26 = int_to_ptr.vmem [resolvable:$true] %s147_s26 }
  0x12   : > { %s1022_s24 = scalar_select %p835_p8, 1, 0 }
  0x13   : > { %p534_p9 = pneg %p835_p8  ;;  %s608_s4 = scalar_lea.hbm %s1011_s1, 256 }
  0x14   : > { %p609_p12 = scmp.ne.s32.totalorder %s1011_s1, %s608_s4  ;;  %p615_p5 = scmp.lt.u32.totalorder %s608_s4, %s1011_s1 }
  0x15   : > { %p844_p11 = pnand %p534_p9, %p815_p1 }
  0x17   : > { %p610_p13 = pneg %p844_p11 }
  0x19   : > { %p611_p0 = pnand %p610_p13, %p609_p12 }
  0x1b   : > { %p612_p3 = pneg %p611_p0 }
  0x1d   : > { %p617_p7 = pnand %p615_p5, %p612_p3 }
  0x1f   : > { %620 = shalt.err (!%p617_p7)
}
  0x20   : > { %s621_s9 = scalar_lea.vmem %s148_s26, 256  ;;  %p629_p1 = scmp.lt.s32.totalorder %s148_s26, %s148_s26 }
  0x21   : > { %p622_p9 = scmp.ne.s32.totalorder %s148_s26, %s621_s9  ;;  %p630_p4 = scmp.lt.s32.totalorder %s621_s9, %s621_s9 }
  0x23   : > { %p624_p10 = pnand %p622_p9, %p610_p13  ;;  %p631_p8 = por %p630_p4, %p629_p1 }
  0x25   : > { %p625_p6 = pneg %p624_p10 }
  0x27   : > { %p632_p2 = pnand %p631_p8, %p625_p6 }
  0x29   : > { %635 = shalt.err (!%p632_p2)
}
  0x2a   : > { %s755_s10 = smov 64   ;;  %s756_s11 = smov 4  }
  0x2b   : > { %537 = dma.hbm_to_vmem [thread:$0]  (!%p844_p11), %s1011_s1, 256, %s148_s26, [#allocation6], %s755_s10, %s755_s10, %s756_s11  }
  0x2c   : > { %p34_p1 = scmp.ge.s32.totalorder %s32_s28, 2  ;;  %s41_s25 = sadd.s32 1, %s740_s14 }
  0x2d   : > { %p48_p2 = scmp.ne.s32.totalorder %s740_s14, %s736_s13  ;;  %p49_p4 = scmp.eq.s32.totalorder %s752_s17, 0 }
  0x2e   : > { %s1039_s28 = smov (%p34_p1, %s32_s28), 0  ;;  %p1025_p8 = scmp.ne.s32.totalorder %s1019_s21, 0 }
  0x2f   : > { %p874_p6 = por %p49_p4, %p48_p2  ;;  %s36_s30 = ssub.s32 %s748_s16, %s1039_s28 }
  0x30   : > { %p880_p10 = por %p1025_p8, %p48_p2  ;;  %p547_p12 = scmp.lt.s32.totalorder %s752_s17, 2 }
  0x31   : > { %p39_p11 = scmp.eq.s32.totalorder %s36_s30, 0  ;;  %s164_s26 = sand.u32 1, %s740_s14  }
  0x32   : > { %s481_s4 = sshll.u32 %s164_s26, 4  ;;  %s502_s6 = sshll.u32 %s748_s16, 8 }
  0x33   : > { %s889_s5 = scalar_select %p39_p11, %s740_s14, %s41_s25  }
  0x34   : > { %s895_s9 = scalar_lea.hbm %s1010_s0, %s502_s6  ;;  %s168_s21 = scalar_lea.vmem [#allocation2], %s481_s4 }
  0x35   : > { %s176_s18 = sshll.u32 %s168_s21, 4  ;;  %p901_p13 = pnand %p547_p12, %p874_p6  ;;  %s897_s18 = int_to_ptr.vmem [resolvable:$true] %s176_s18 }
  0x36   : > { %s905_s25 = scalar_lea.sflag [#allocation3], %s164_s26  ;;  %s636_s30 = scalar_lea.hbm %s895_s9, 256 }
  0x37   : > { %p637_p0 = scmp.ne.s32.totalorder %s895_s9, %s636_s30  ;;  %p638_p3 = pneg %p901_p13 }
  0x38   : > { %s641_s29 = scalar_lea.hbm %s1010_s0, 512  ;;  %p642_p9 = scmp.lt.u32.totalorder %s895_s9, %s1010_s0 }
  0x39   : > { %p639_p5 = pnand %p638_p3, %p637_p0  ;;  %p643_p1 = scmp.lt.u32.totalorder %s641_s29, %s636_s30 }
  0x3a   : > { %p645_p4 = scmp.lt.u32.totalorder %s636_s30, %s895_s9 }
  0x3b   : > { %p640_p7 = pneg %p639_p5  ;;  %p644_p2 = por %p643_p1, %p642_p9 }
  0x3d   : > { %p646_p6 = por %p645_p4, %p644_p2 }
  0x3f   : > { %p647_p8 = pnand %p646_p6, %p640_p7 }
  0x41   : > { %650 = shalt.err (!%p647_p8)
}
  0x42   : > { %s651_s26 = scalar_lea.vmem %s897_s18, 256  ;;  %s757_s21 = smov [#allocation2]  }
  0x43   : > { %p652_p12 = scmp.ne.s32.totalorder %s897_s18, %s651_s26  ;;  %s656_s4 = sshll.u32 %s757_s21, 4  ;;  %s657_s4 = int_to_ptr.vmem [resolvable:$false] %s656_s4 }
  0x44   : > { %s658_s6 = scalar_lea.vmem %s657_s4, 512  ;;  %p659_p5 = scmp.lt.s32.totalorder %s897_s18, %s657_s4 }
  0x45   : > { %p654_p11 = pnand %p652_p12, %p638_p3  ;;  %p660_p9 = scmp.lt.s32.totalorder %s658_s6, %s651_s26 }
  0x47   : > { %p655_p0 = pneg %p654_p11  ;;  %p661_p1 = por %p660_p9, %p659_p5 }
  0x49   : > { %p662_p2 = pnand %p661_p1, %p655_p0 }
  0x4b   : > { %665 = shalt.err (!%p662_p2)
}
  0x4c   : > { %541 = dma.hbm_to_vmem [thread:$0]  (!%p901_p13), %s895_s9, 256, %s897_s18, %s905_s25, %s755_s10, %s755_s10, %s756_s11  }
  0x4d   : > { %p1028_p3 = scmp.ne.s32.totalorder %s1022_s24, 0 }
  0x4e   : > { %s939_s30 = sand.u32 (!%p1028_p3), 1, %s736_s13   ;;  %p1029_p7 = scmp.ne.s32.totalorder (!%p1028_p3), %s1020_s22, 0 }
  0x4f   : > { %188 = sbr.rel (%p1028_p3) target bundleno = 438 (0x1b6), region = 32  ;;  %s485_s29 = sshll.u32 (!%p1028_p3), %s939_s30, 4 }
  0x50   : > { %s191_s7 = scalar_lea.sflag (!%p1028_p3), [#allocation3], %s939_s30  ;;  %s194_s8 = scalar_lea.vmem (!%p1028_p3), [#allocation2], %s485_s29 }
  0x56   : > { %719 = dma.done.wait (%p1029_p7), %s191_s7, 256  }
  0x57   : > { %721 = vsyncadd (%p1029_p7), %s191_s7, 4294967040  ;;  %p1030_p4 = scmp.ne.s32.totalorder %s1018_s20, 0 }
  0x59   : > { %723 = dma.done.wait (%p1030_p4), [#allocation6], 256  }
  0x5a   : > { %725 = vsyncadd (%p1030_p4), [#allocation6], 4294967040  ;;  %v604_v0 = vld [vmem:[%s194_s8] sm:$0xff]   ;;  %v605_v1 = vld [vmem:[%s194_s8 + $0x8] sm:$0xff]   ;;  %vm278_vm0 = vcmask 261120   ;;  %s487_s20 = sshll.u32 %s939_s30, 6 }
  0x5b   : > { %250 = vxpose.xlu0.c.b16.start [1/2] (short) (narrow) %v604_v0, 64  ;;  %v606_v2 = vld [vmem:[#allocation5] sm:$0xff]   ;;  %v607_v3 = vld [vmem:[#allocation5 + $0x8] sm:$0xff]   ;;  %s220_s10 = scalar_lea.vmem [#allocation7], %s487_s20  ;;  %s503_s9 = sshll.u32 %s744_s15, 10 }
  0x5c   : > { %510 = vmatprep.subr.bf16.mxu0 %v606_v2  ;;  %522 = vmatprep.subr.bf16.mxu1 %v606_v2  ;;  %v488_v8 = vld [vmem:[%s1012_s2] ss:$0 sm:$0xff]  ;;  %s380_s11 = sshll.u32 %s220_s10, 4  ;;  %s961_s25 = scalar_lea.hbm %s1013_s3, %s503_s9  ;;  %s956_s11 = int_to_ptr.vmem [resolvable:$true] %s380_s11 }
  0x5d   : > { %511 = vmatpush3.bf16.msra.mxu0 %v606_v2  ;;  %524 = vmatpush3.bf16.msra.mxu1 %v606_v2  ;;  %s365_s15 = scalar_lea.sflag [#allocation4], %s939_s30  ;;  %s666_s26 = scalar_lea.vmem %s956_s11, 1024 }
  0x5e   : > { %512 = vmatprep.subr.bf16.mxu0 %v607_v3  ;;  %523 = vmatprep.subr.bf16.mxu1 %v607_v3  ;;  %p667_p13 = scmp.ne.s32.totalorder %s956_s11, %s666_s26  ;;  %s758_s21 = smov [#allocation7]  }
  0x5f   : > { %251 = vxpose.xlu0.c.b16.end [2/2] (short) (narrow) %v605_v1, 64  ;;  %s670_s4 = sshll.u32 %s758_s21, 4  ;;  %s671_s4 = int_to_ptr.vmem [resolvable:$false] %s670_s4 }
  0x60   : > { %p668_p6 = pnand %p667_p13, %p880_p10  ;;  %s672_s6 = scalar_lea.vmem %s671_s4, 2048 }
  0x61   : > { %513 = vmatpush3.bf16.msra.mxu0 %v607_v3  ;;  %525 = vmatpush3.bf16.msra.mxu1 %v607_v3  ;;  %p673_p12 = scmp.lt.s32.totalorder %s956_s11, %s671_s4  ;;  %p674_p11 = scmp.lt.s32.totalorder %s672_s6, %s666_s26 }
  0x62   : > { %p669_p8 = pneg %p668_p6 }
  0x63   : > { %p675_p0 = por %p674_p11, %p673_p12 }
  0x65   : > { %p676_p5 = pnand %p675_p0, %p669_p8 }
  0xc1   : > { %v258_v4 = vpop.trf.xlu0 }
  0xc2   : > { %514 = vmatprep.mubr.msk.bf16.mxu0 %vm278_vm0, %v258_v4 }
  0xc5   : > { %v259_v5 = vpop.trf.xlu0 }
  0xc6   : > { %515 = vmatmul.mubr.msk.bf16.vlgmr.msra.gmra.mrb[0].mxu0 %vm278_vm0, %v259_v5 }
  0xc9   : > { %v260_v6 = vpop.trf.xlu0 }
  0xca   : > { %518 = vmatprep.mubr.msk.bf16.mxu1 %vm278_vm0, %v260_v6 }
  0xcd   : > { %v261_v7 = vpop.trf.xlu0 }
  0xce   : > { %519 = vmatmul.mubr.msk.bf16.vlgmr.msra.gmra.mrb[0].mxu1 %vm278_vm0, %v261_v7 }
 0x199   : > { %v516_v9 = vpop.f32.mrb[0].mxu0 }
 0x19a   : > { %v334_v10 = vadd.f32 %v516_v9, %v488_v8  ;;  %v325_v11 = vpop.f32.mrb[1].mxu0 }
 0x19b   : > { %v326_v12 = vadd.f32 %v488_v8, %v325_v11  ;;  %v517_v13 = vpop.f32.mrb[2].mxu0 }
 0x19c   : > { %358 = vst [vmem:[%s220_s10 + $0x10] sm:$0xff] %v334_v10  ;;  %v337_v14 = vadd.f32 %v517_v13, %v488_v8  ;;  %v328_v15 = vpop.f32.mrb[3].mxu0 }
 0x19d   : > { %356 = vst [vmem:[%s220_s10] sm:$0xff] %v326_v12  ;;  %v329_v16 = vadd.f32 %v488_v8, %v328_v15 }
 0x19e   : > { %359 = vst [vmem:[%s220_s10 + $0x18] sm:$0xff] %v337_v14 }
 0x19f   : > { %357 = vst [vmem:[%s220_s10 + $0x8] sm:$0xff] %v329_v16 }
 0x1a1   : > { %v520_v17 = vpop.f32.mrb[0].mxu1 }
 0x1a2   : > { %v350_v18 = vadd.f32 %v520_v17, %v488_v8  ;;  %v341_v19 = vpop.f32.mrb[1].mxu1 }
 0x1a3   : > { %v342_v20 = vadd.f32 %v488_v8, %v341_v19  ;;  %v521_v21 = vpop.f32.mrb[2].mxu1 }
 0x1a4   : > { %362 = vst [vmem:[%s220_s10 + $0x30] sm:$0xff] %v350_v18  ;;  %v353_v22 = vadd.f32 %v521_v21, %v488_v8  ;;  %v344_v23 = vpop.f32.mrb[3].mxu1 }
 0x1a5   : > { %360 = vst [vmem:[%s220_s10 + $0x20] sm:$0xff] %v342_v20  ;;  %v345_v24 = vadd.f32 %v488_v8, %v344_v23 }
 0x1a6   : > { %363 = vst [vmem:[%s220_s10 + $0x38] sm:$0xff] %v353_v22 }
 0x1a7   : > { %361 = vst [vmem:[%s220_s10 + $0x28] sm:$0xff] %v345_v24 }
 0x1a8   : > { %679 = shalt.err (!%p676_p5)
}
 0x1a9   : > { %s680_s29 = scalar_lea.hbm %s961_s25, 1024  ;;  %s684_s20 = scalar_lea.hbm %s1013_s3, 2048 }
 0x1aa   : > { %p681_p9 = scmp.ne.s32.totalorder %s961_s25, %s680_s29  ;;  %p685_p3 = scmp.lt.u32.totalorder %s961_s25, %s1013_s3 }
 0x1ab   : > { %p686_p7 = scmp.lt.u32.totalorder %s684_s20, %s680_s29  ;;  %p688_p13 = scmp.lt.u32.totalorder %s680_s29, %s961_s25 }
 0x1ac   : > { %p682_p1 = pnand %p681_p9, %p880_p10 }
 0x1ad   : > { %p687_p4 = por %p686_p7, %p685_p3 }
 0x1ae   : > { %p683_p2 = pneg %p682_p1 }
 0x1af   : > { %p689_p6 = por %p688_p13, %p687_p4 }
 0x1b1   : > { %p690_p8 = pnand %p689_p6, %p683_p2 }
 0x1b3   : > { %693 = shalt.err (!%p690_p8)
}
 0x1b4   : > { %s759_s10 = smov 128   ;;  %s760_s9 = smov 8  }
 0x1b5   : > { %532 = dma.vmem_to_hbm [thread:$0]  (%p880_p10), %s956_s11, 1024, %s961_s25, %s365_s15, %s759_s10, %s759_s10, %s760_s9  }
 0x1b6 PF: > { %s395_s18 = sand.u32 1, %s732_s12   ;;  %p1031_p12 = scmp.ne.s32.totalorder %s1021_s23, 0 }
 0x1b7   : > { %p1032_p11 = scmp.ge.s32.totalorder %s752_s17, 2  ;;  %s396_s19 = scalar_lea.sflag [#allocation4], %s395_s18 }
 0x1b9   : > { %p543_p0 = pnand %p1032_p11, %p1031_p12 }
 0x1bb   : > { %727 = dma.done.wait (!%p543_p0), %s396_s19, 1024  }
 0x1bc   : > { %729 = vsyncadd (!%p543_p0), %s396_s19, 4294966272  ;;  %s20_s17 = sadd.s32 1, %s752_s17   ;;  %s1033_s12 = smov %s736_s13 }
 0x1bd   : > { %p17_p5 = scmp.ge.s32.totalorder %s20_s17, 4   ;;  %s1034_s13 = smov %s740_s14 }
 0x1be   : > { %s1035_s14 = smov %s889_s5  ;;  %s1036_s15 = smov %s748_s16 }
 0x1bf   : > { %s1037_s16 = smov %s1039_s28  ;;  %19 = sbr.rel (!%p17_p5) target bundleno = 7 (0x7), region = 81 }
 0x1c6   :  { %401 = vsyncpa [#allocation3], 1 }
 0x1c7   :  { %403 = vsyncpa [#allocation3 + $0x1], 1 }
 0x1c8   :  { %404 = vsyncpa [#allocation6], 1 }
 0x1c9   :  { %405 = vsyncpa [#allocation4], 1 }
 0x1ca   :  { %407 = vsyncpa [#allocation4 + $0x1], 1 }

</bundles_post_ra>
